<compile_context>
chip_gen: v5e
topology: v5e:2x2
jax: 0.10.0
libtpu: 0.0.40
codegen_flags: <defaults>
</compile_context>

<pallas_src>
import math
import functools

import jax
import jax.numpy as jnp
from jax import lax
from jax.experimental import pallas as pl
from jax.experimental.pallas import tpu as pltpu


# ----------------------------------------------------------------------------
# Kernel 1: per (batch, query-tile) fused QKV projection + per-head attention
# ----------------------------------------------------------------------------
def _attn_kernel(xq_ref, xk_ref, xv_ref, wq_ref, wk_ref, wv_ref, heads_ref,
                 *, num_heads, d_query, out_dtype):
    # xq_ref           : (1, TQ, D)   activations (compute dtype)
    # xk_ref, xv_ref   : (1, S,  D)
    # wq/wk/wv_ref     : (D, H*dq)    fused projection weights (scale folded in wq)
    # heads_ref        : (1, H, TQ, dq)
    xq = xq_ref[0]
    xk = xk_ref[0]
    xv = xv_ref[0]

    # Fused wide projections: one MXU matmul each with N = H*dq = d_model.
    q = jnp.dot(xq, wq_ref[...], preferred_element_type=jnp.float32).astype(xq.dtype)
    k = jnp.dot(xk, wk_ref[...], preferred_element_type=jnp.float32).astype(xk.dtype)
    v = jnp.dot(xv, wv_ref[...], preferred_element_type=jnp.float32).astype(xv.dtype)

    # TODO(synk): optional attention mask (masked_fill) not implemented; mask=None path only.
    # TODO(synk): for very long S, add a KV-tile grid axis with online softmax
    # (flash-style) so the (TQ, S) scores tile stays bounded (v7x 64 MiB VMEM).
    for h in range(num_heads):                             # static unroll, H is small
        lo = h * d_query
        qh = q[:, lo:lo + d_query]                         # (TQ, dq)
        kh = k[:, lo:lo + d_query]                         # (S,  dq)
        vh = v[:, lo:lo + d_query]                         # (S,  dq)

        # NT matmul (contract last dims) -> maps straight to the MXU, no transpose.
        scores = lax.dot_general(qh, kh, (((1,), (1,)), ((), ())),
                                 preferred_element_type=jnp.float32)   # (TQ, S) f32

        m = jnp.max(scores, axis=-1, keepdims=True)
        p = jnp.exp(scores - m)
        denom = jnp.sum(p, axis=-1, keepdims=True)
        attn = p * pl.reciprocal(denom, approx=True)       # EUP vrcp, VALU-free

        head = jnp.dot(attn.astype(vh.dtype), vh,
                       preferred_element_type=jnp.float32)             # (TQ, dq)
        heads_ref[0, h, :, :] = head.astype(out_dtype)


# ----------------------------------------------------------------------------
# Kernel 2: output projection (nn.Linear, bias=False): out = x @ Wout.T
#           Tiled over M = B*S; NT dot_general, no in-kernel transpose.
# ----------------------------------------------------------------------------
def _wout_kernel(x_ref, w_ref, o_ref):
    # x_ref : (TM, D), w_ref : (D, D) Linear weight (out_features, in_features)
    o_ref[...] = lax.dot_general(
        x_ref[...], w_ref[...], (((1,), (1,)), ((), ())),
        preferred_element_type=jnp.float32).astype(o_ref.dtype)


# ----------------------------------------------------------------------------
# Wrapper
# ----------------------------------------------------------------------------
def multi_head_attention(x_query, x_key, x_value, Qw, Kw, Vw, Wout_w,
                         *, compute_dtype=jnp.bfloat16, q_tile=None,
                         m_tile=None):
    B, S, D = x_query.shape
    H, D2, dq = Qw.shape
    assert D2 == D and H * dq == D
    scale = 1.0 / math.sqrt(dq)

    # One-time wrapper-side packing: per-head (D, dq) weights -> (D, H*dq),
    # so wq[d, h*dq + e] == Qw[h, d, e].  The 1/sqrt(dq) scale is folded into
    # the Q weight (same single pass over the weights); cast to bf16 after.
    wq = (jnp.transpose(Qw, (1, 0, 2)).reshape(D, D) * scale).astype(compute_dtype)
    wk = jnp.transpose(Kw, (1, 0, 2)).reshape(D, D).astype(compute_dtype)
    wv = jnp.transpose(Vw, (1, 0, 2)).reshape(D, D).astype(compute_dtype)
    xq = x_query.astype(compute_dtype)
    xk = x_key.astype(compute_dtype)
    xv = x_value.astype(compute_dtype)

    TQ = S if q_tile is None else q_tile
    assert S % TQ == 0
    grid = (B, S // TQ)

    # <= physical VMEM on all of v5e / v6e / v7x.
    vmem_cap = 64 * 1024 * 1024

    heads = pl.pallas_call(
        functools.partial(_attn_kernel, num_heads=H, d_query=dq,
                          out_dtype=compute_dtype),
        out_shape=jax.ShapeDtypeStruct((B, H, S, dq), compute_dtype),
        grid_spec=pltpu.PrefetchScalarGridSpec(
            num_scalar_prefetch=0,
            grid=grid,
            in_specs=[
                pl.BlockSpec((1, TQ, D), lambda b, qt: (b, qt, 0)),
                pl.BlockSpec((1, S, D), lambda b, qt: (b, 0, 0)),
                pl.BlockSpec((1, S, D), lambda b, qt: (b, 0, 0)),
                pl.BlockSpec((D, D), lambda b, qt: (0, 0)),   # weights resident
                pl.BlockSpec((D, D), lambda b, qt: (0, 0)),
                pl.BlockSpec((D, D), lambda b, qt: (0, 0)),
            ],
            out_specs=pl.BlockSpec((1, H, TQ, dq), lambda b, qt: (b, 0, qt, 0)),
        ),
        compiler_params=pltpu.CompilerParams(
            dimension_semantics=("parallel", "parallel"),
            vmem_limit_bytes=vmem_cap),
    )(xq, xk, xv, wq, wk, wv)

    # Faithful quirk: heads.view(B, S, -1) on a contiguous (B, H, S, dq)
    # tensor (raw row-major reshape).  Contiguous reshape -> no data movement.
    heads_flat = heads.reshape(B, S, D)

    # --- output projection as a tiled matmul over M = B*S ---
    M = B * S
    if m_tile is not None:
        TM = m_tile
    else:
        TM = M
        for cand in (512, 256, 128):
            if M % cand == 0:
                TM = cand
                break
    assert M % TM == 0

    out_flat = pl.pallas_call(
        _wout_kernel,
        out_shape=jax.ShapeDtypeStruct((M, D), jnp.float32),
        grid_spec=pltpu.PrefetchScalarGridSpec(
            num_scalar_prefetch=0,
            grid=(M // TM,),
            in_specs=[
                pl.BlockSpec((TM, D), lambda i: (i, 0)),
                pl.BlockSpec((D, D), lambda i: (0, 0)),   # weight resident across M
            ],
            out_specs=pl.BlockSpec((TM, D), lambda i: (i, 0)),
        ),
        compiler_params=pltpu.CompilerParams(
            dimension_semantics=("parallel",),
            vmem_limit_bytes=vmem_cap),
    )(heads_flat.reshape(M, D), Wout_w.astype(compute_dtype))

    return out_flat.reshape(B, S, D)


# ----------------------------------------------------------------------------
# Pure-JAX f32 reference (mirrors the PyTorch forward exactly)
# ----------------------------------------------------------------------------
def reference(x_query, x_key, x_value, Qw, Kw, Vw, Wout_w):
    B, S, D = x_query.shape
    H, _, dq = Qw.shape
    q = jnp.einsum('bsd,hde->bhse', x_query, Qw)
    k = jnp.einsum('bsd,hde->bhse', x_key, Kw)
    v = jnp.einsum('bsd,hde->bhse', x_value, Vw)
    scores = jnp.einsum('bhse,bhte->bhst', q, k) / math.sqrt(dq)
    attn = jax.nn.softmax(scores, axis=-1)
    heads = jnp.einsum('bhst,bhte->bhse', attn, v)       # (B, H, S, dq)
    heads_flat = heads.reshape(B, S, D)                  # raw view, as in PyTorch
    return heads_flat @ Wout_w.T


# ----------------------------------------------------------------------------
# Deterministic parameter init (kaiming_uniform-style bounds, a=sqrt(5))
# ----------------------------------------------------------------------------
def init_params(key, num_heads, d_model):
    dq = d_model // num_heads
    kq, kk, kv, kw = jax.random.split(key, 4)
    fan_in = d_model * dq
    gain = math.sqrt(2.0 / (1.0 + 5.0))          # a = sqrt(5)
    bound = math.sqrt(3.0) * gain / math.sqrt(fan_in)
    Qw = jax.random.uniform(kq, (num_heads, d_model, dq), jnp.float32, -bound, bound)
    Kw = jax.random.uniform(kk, (num_heads, d_model, dq), jnp.float32, -bound, bound)
    Vw = jax.random.uniform(kv, (num_heads, d_model, dq), jnp.float32, -bound, bound)
    wb = math.sqrt(3.0) * gain / math.sqrt(d_model)
    Wout_w = jax.random.uniform(kw, (d_model, d_model), jnp.float32, -wb, wb)
    return Qw, Kw, Vw, Wout_w


if __name__ == "__main__":
    B, S = 2, 8
    num_heads, d_model = 4, 32

    key = jax.random.PRNGKey(0)
    kx, kxk, kxv, kp = jax.random.split(key, 4)
    x_query = jax.random.normal(kx, (B, S, d_model), jnp.float32)
    x_key = jax.random.normal(kxk, (B, S, d_model), jnp.float32)
    x_value = jax.random.normal(kxv, (B, S, d_model), jnp.float32)
    Qw, Kw, Vw, Wout_w = init_params(kp, num_heads, d_model)

    out = multi_head_attention(x_query, x_key, x_value, Qw, Kw, Vw, Wout_w)
    out = jax.block_until_ready(out)

    ref = reference(x_query, x_key, x_value, Qw, Kw, Vw, Wout_w)
    assert out.shape == (B, S, d_model)
    # bf16 MXU path (f32 accumulation) + approx reciprocal -> loosened tolerance.
    assert jnp.allclose(out, ref, atol=3e-2, rtol=3e-2), "mismatch vs reference"

    print("KERNEL_OK")
</pallas_src>

<mosaic_0001>
module attributes {stable_mosaic.version = 11 : i64} {
  func.func @_attn_kernel(%arg0: i32, %arg1: i32, %arg2: memref<1x8x32xbf16, #tpu.memory_space<vmem>>, %arg3: memref<1x8x32xbf16, #tpu.memory_space<vmem>>, %arg4: memref<1x8x32xbf16, #tpu.memory_space<vmem>>, %arg5: memref<32x32xbf16, #tpu.memory_space<vmem>>, %arg6: memref<32x32xbf16, #tpu.memory_space<vmem>>, %arg7: memref<32x32xbf16, #tpu.memory_space<vmem>>, %arg8: memref<1x4x8x8xbf16, #tpu.memory_space<vmem>>) attributes {dimension_semantics = [#tpu.dimension_semantics<parallel>, #tpu.dimension_semantics<parallel>], iteration_bounds = array<i64: 2, 1>, scalar_prefetch = 0 : i64, scratch_operands = 0 : i64, tpu.core_type = #tpu.core_type<tc>, window_params = [{transform_indices = @transform_0, window_bounds = array<i64: 1, 8, 32>}, {transform_indices = @transform_1, window_bounds = array<i64: 1, 8, 32>}, {transform_indices = @transform_2, window_bounds = array<i64: 1, 8, 32>}, {pipeline_mode = #tpu.pipeline_mode<synchronous>, transform_indices = @transform_3, window_bounds = array<i64: 32, 32>}, {pipeline_mode = #tpu.pipeline_mode<synchronous>, transform_indices = @transform_4, window_bounds = array<i64: 32, 32>}, {pipeline_mode = #tpu.pipeline_mode<synchronous>, transform_indices = @transform_5, window_bounds = array<i64: 32, 32>}, {transform_indices = @transform_6, window_bounds = array<i64: 1, 4, 8, 8>}]} {
    %c0 = arith.constant 0 : index
    %c0_0 = arith.constant 0 : index
    %c0_1 = arith.constant 0 : index
    %0 = vector.load %arg2[%c0, %c0_0, %c0_1] : memref<1x8x32xbf16, #tpu.memory_space<vmem>>, vector<1x8x32xbf16>
    %1 = vector.shape_cast %0 : vector<1x8x32xbf16> to vector<8x32xbf16>
    %c0_2 = arith.constant 0 : index
    %c0_3 = arith.constant 0 : index
    %c0_4 = arith.constant 0 : index
    %2 = vector.load %arg3[%c0_2, %c0_3, %c0_4] : memref<1x8x32xbf16, #tpu.memory_space<vmem>>, vector<1x8x32xbf16>
    %3 = vector.shape_cast %2 : vector<1x8x32xbf16> to vector<8x32xbf16>
    %c0_5 = arith.constant 0 : index
    %c0_6 = arith.constant 0 : index
    %c0_7 = arith.constant 0 : index
    %4 = vector.load %arg4[%c0_5, %c0_6, %c0_7] : memref<1x8x32xbf16, #tpu.memory_space<vmem>>, vector<1x8x32xbf16>
    %5 = vector.shape_cast %4 : vector<1x8x32xbf16> to vector<8x32xbf16>
    %c0_8 = arith.constant 0 : index
    %c0_9 = arith.constant 0 : index
    %6 = vector.load %arg5[%c0_8, %c0_9] : memref<32x32xbf16, #tpu.memory_space<vmem>>, vector<32x32xbf16>
    %cst = arith.constant dense<0.000000e+00> : vector<8x32xf32>
    %7 = tpu.matmul %1, %6, %cst {dimension_numbers = #tpu.dot_dimension_numbers<[1], [0], [0], [1], [0, 0, 1, 1], [], []>} : vector<8x32xbf16>, vector<32x32xbf16>, vector<8x32xf32> -> vector<8x32xf32>
    %8 = arith.truncf %7 : vector<8x32xf32> to vector<8x32xbf16>
    %c0_10 = arith.constant 0 : index
    %c0_11 = arith.constant 0 : index
    %9 = vector.load %arg6[%c0_10, %c0_11] : memref<32x32xbf16, #tpu.memory_space<vmem>>, vector<32x32xbf16>
    %cst_12 = arith.constant dense<0.000000e+00> : vector<8x32xf32>
    %10 = tpu.matmul %3, %9, %cst_12 {dimension_numbers = #tpu.dot_dimension_numbers<[1], [0], [0], [1], [0, 0, 1, 1], [], []>} : vector<8x32xbf16>, vector<32x32xbf16>, vector<8x32xf32> -> vector<8x32xf32>
    %11 = arith.truncf %10 : vector<8x32xf32> to vector<8x32xbf16>
    %c0_13 = arith.constant 0 : index
    %c0_14 = arith.constant 0 : index
    %12 = vector.load %arg7[%c0_13, %c0_14] : memref<32x32xbf16, #tpu.memory_space<vmem>>, vector<32x32xbf16>
    %cst_15 = arith.constant dense<0.000000e+00> : vector<8x32xf32>
    %13 = tpu.matmul %5, %12, %cst_15 {dimension_numbers = #tpu.dot_dimension_numbers<[1], [0], [0], [1], [0, 0, 1, 1], [], []>} : vector<8x32xbf16>, vector<32x32xbf16>, vector<8x32xf32> -> vector<8x32xf32>
    %14 = arith.truncf %13 : vector<8x32xf32> to vector<8x32xbf16>
    %15 = vector.extract_strided_slice %8 {offsets = [0, 0], sizes = [8, 8], strides = [1, 1]} : vector<8x32xbf16> to vector<8x8xbf16>
    %16 = vector.extract_strided_slice %11 {offsets = [0, 0], sizes = [8, 8], strides = [1, 1]} : vector<8x32xbf16> to vector<8x8xbf16>
    %17 = vector.extract_strided_slice %14 {offsets = [0, 0], sizes = [8, 8], strides = [1, 1]} : vector<8x32xbf16> to vector<8x8xbf16>
    %cst_16 = arith.constant dense<0.000000e+00> : vector<8x8xf32>
    %18 = tpu.matmul %15, %16, %cst_16 {dimension_numbers = #tpu.dot_dimension_numbers<[1], [1], [0], [0], [0, 0, 1, 0], [], []>} : vector<8x8xbf16>, vector<8x8xbf16>, vector<8x8xf32> -> vector<8x8xf32>
    %cst_17 = arith.constant dense<0xFF800000> : vector<8xf32>
    %19 = vector.multi_reduction <maximumf>, %18, %cst_17 [1] : vector<8x8xf32> to vector<8xf32>
    %20 = vector.shape_cast %19 : vector<8xf32> to vector<8x1xf32>
    %21 = vector.broadcast %20 : vector<8x1xf32> to vector<8x8xf32>
    %22 = arith.subf %18, %21 : vector<8x8xf32>
    %23 = math.exp %22 : vector<8x8xf32>
    %cst_18 = arith.constant dense<0.000000e+00> : vector<8xf32>
    %24 = vector.multi_reduction <add>, %23, %cst_18 [1] : vector<8x8xf32> to vector<8xf32>
    %25 = vector.shape_cast %24 : vector<8xf32> to vector<8x1xf32>
    %26 = tpu.reciprocal %25 {approx = true} : vector<8x1xf32> -> vector<8x1xf32>
    %27 = vector.broadcast %26 : vector<8x1xf32> to vector<8x8xf32>
    %28 = arith.mulf %23, %27 : vector<8x8xf32>
    %29 = arith.truncf %28 : vector<8x8xf32> to vector<8x8xbf16>
    %cst_19 = arith.constant dense<0.000000e+00> : vector<8x8xf32>
    %30 = tpu.matmul %29, %17, %cst_19 {dimension_numbers = #tpu.dot_dimension_numbers<[1], [0], [0], [1], [0, 0, 1, 1], [], []>} : vector<8x8xbf16>, vector<8x8xbf16>, vector<8x8xf32> -> vector<8x8xf32>
    %31 = arith.truncf %30 : vector<8x8xf32> to vector<8x8xbf16>
    %c0_20 = arith.constant 0 : index
    %c0_21 = arith.constant 0 : index
    %c0_22 = arith.constant 0 : index
    %c0_23 = arith.constant 0 : index
    %32 = vector.load %arg8[%c0_20, %c0_21, %c0_22, %c0_23] : memref<1x4x8x8xbf16, #tpu.memory_space<vmem>>, vector<1x1x8x8xbf16>
    %33 = vector.shape_cast %32 : vector<1x1x8x8xbf16> to vector<8x8xbf16>
    %34 = vector.shape_cast %31 : vector<8x8xbf16> to vector<1x1x8x8xbf16>
    tpu.vector_store %arg8[%c0_20, %c0_21, %c0_22, %c0_23], %34 {strides = array<i32>} : memref<1x4x8x8xbf16, #tpu.memory_space<vmem>>, vector<1x1x8x8xbf16>,
    %35 = vector.extract_strided_slice %8 {offsets = [0, 8], sizes = [8, 8], strides = [1, 1]} : vector<8x32xbf16> to vector<8x8xbf16>
    %36 = vector.extract_strided_slice %11 {offsets = [0, 8], sizes = [8, 8], strides = [1, 1]} : vector<8x32xbf16> to vector<8x8xbf16>
    %37 = vector.extract_strided_slice %14 {offsets = [0, 8], sizes = [8, 8], strides = [1, 1]} : vector<8x32xbf16> to vector<8x8xbf16>
    %cst_24 = arith.constant dense<0.000000e+00> : vector<8x8xf32>
    %38 = tpu.matmul %35, %36, %cst_24 {dimension_numbers = #tpu.dot_dimension_numbers<[1], [1], [0], [0], [0, 0, 1, 0], [], []>} : vector<8x8xbf16>, vector<8x8xbf16>, vector<8x8xf32> -> vector<8x8xf32>
    %cst_25 = arith.constant dense<0xFF800000> : vector<8xf32>
    %39 = vector.multi_reduction <maximumf>, %38, %cst_25 [1] : vector<8x8xf32> to vector<8xf32>
    %40 = vector.shape_cast %39 : vector<8xf32> to vector<8x1xf32>
    %41 = vector.broadcast %40 : vector<8x1xf32> to vector<8x8xf32>
    %42 = arith.subf %38, %41 : vector<8x8xf32>
    %43 = math.exp %42 : vector<8x8xf32>
    %cst_26 = arith.constant dense<0.000000e+00> : vector<8xf32>
    %44 = vector.multi_reduction <add>, %43, %cst_26 [1] : vector<8x8xf32> to vector<8xf32>
    %45 = vector.shape_cast %44 : vector<8xf32> to vector<8x1xf32>
    %46 = tpu.reciprocal %45 {approx = true} : vector<8x1xf32> -> vector<8x1xf32>
    %47 = vector.broadcast %46 : vector<8x1xf32> to vector<8x8xf32>
    %48 = arith.mulf %43, %47 : vector<8x8xf32>
    %49 = arith.truncf %48 : vector<8x8xf32> to vector<8x8xbf16>
    %cst_27 = arith.constant dense<0.000000e+00> : vector<8x8xf32>
    %50 = tpu.matmul %49, %37, %cst_27 {dimension_numbers = #tpu.dot_dimension_numbers<[1], [0], [0], [1], [0, 0, 1, 1], [], []>} : vector<8x8xbf16>, vector<8x8xbf16>, vector<8x8xf32> -> vector<8x8xf32>
    %51 = arith.truncf %50 : vector<8x8xf32> to vector<8x8xbf16>
    %c0_28 = arith.constant 0 : index
    %c1 = arith.constant 1 : index
    %c0_29 = arith.constant 0 : index
    %c0_30 = arith.constant 0 : index
    %52 = vector.load %arg8[%c0_28, %c1, %c0_29, %c0_30] : memref<1x4x8x8xbf16, #tpu.memory_space<vmem>>, vector<1x1x8x8xbf16>
    %53 = vector.shape_cast %52 : vector<1x1x8x8xbf16> to vector<8x8xbf16>
    %54 = vector.shape_cast %51 : vector<8x8xbf16> to vector<1x1x8x8xbf16>
    tpu.vector_store %arg8[%c0_28, %c1, %c0_29, %c0_30], %54 {strides = array<i32>} : memref<1x4x8x8xbf16, #tpu.memory_space<vmem>>, vector<1x1x8x8xbf16>,
    %55 = vector.extract_strided_slice %8 {offsets = [0, 16], sizes = [8, 8], strides = [1, 1]} : vector<8x32xbf16> to vector<8x8xbf16>
    %56 = vector.extract_strided_slice %11 {offsets = [0, 16], sizes = [8, 8], strides = [1, 1]} : vector<8x32xbf16> to vector<8x8xbf16>
    %57 = vector.extract_strided_slice %14 {offsets = [0, 16], sizes = [8, 8], strides = [1, 1]} : vector<8x32xbf16> to vector<8x8xbf16>
    %cst_31 = arith.constant dense<0.000000e+00> : vector<8x8xf32>
    %58 = tpu.matmul %55, %56, %cst_31 {dimension_numbers = #tpu.dot_dimension_numbers<[1], [1], [0], [0], [0, 0, 1, 0], [], []>} : vector<8x8xbf16>, vector<8x8xbf16>, vector<8x8xf32> -> vector<8x8xf32>
    %cst_32 = arith.constant dense<0xFF800000> : vector<8xf32>
    %59 = vector.multi_reduction <maximumf>, %58, %cst_32 [1] : vector<8x8xf32> to vector<8xf32>
    %60 = vector.shape_cast %59 : vector<8xf32> to vector<8x1xf32>
    %61 = vector.broadcast %60 : vector<8x1xf32> to vector<8x8xf32>
    %62 = arith.subf %58, %61 : vector<8x8xf32>
    %63 = math.exp %62 : vector<8x8xf32>
    %cst_33 = arith.constant dense<0.000000e+00> : vector<8xf32>
    %64 = vector.multi_reduction <add>, %63, %cst_33 [1] : vector<8x8xf32> to vector<8xf32>
    %65 = vector.shape_cast %64 : vector<8xf32> to vector<8x1xf32>
    %66 = tpu.reciprocal %65 {approx = true} : vector<8x1xf32> -> vector<8x1xf32>
    %67 = vector.broadcast %66 : vector<8x1xf32> to vector<8x8xf32>
    %68 = arith.mulf %63, %67 : vector<8x8xf32>
    %69 = arith.truncf %68 : vector<8x8xf32> to vector<8x8xbf16>
    %cst_34 = arith.constant dense<0.000000e+00> : vector<8x8xf32>
    %70 = tpu.matmul %69, %57, %cst_34 {dimension_numbers = #tpu.dot_dimension_numbers<[1], [0], [0], [1], [0, 0, 1, 1], [], []>} : vector<8x8xbf16>, vector<8x8xbf16>, vector<8x8xf32> -> vector<8x8xf32>
    %71 = arith.truncf %70 : vector<8x8xf32> to vector<8x8xbf16>
    %c0_35 = arith.constant 0 : index
    %c2 = arith.constant 2 : index
    %c0_36 = arith.constant 0 : index
    %c0_37 = arith.constant 0 : index
    %72 = vector.load %arg8[%c0_35, %c2, %c0_36, %c0_37] : memref<1x4x8x8xbf16, #tpu.memory_space<vmem>>, vector<1x1x8x8xbf16>
    %73 = vector.shape_cast %72 : vector<1x1x8x8xbf16> to vector<8x8xbf16>
    %74 = vector.shape_cast %71 : vector<8x8xbf16> to vector<1x1x8x8xbf16>
    tpu.vector_store %arg8[%c0_35, %c2, %c0_36, %c0_37], %74 {strides = array<i32>} : memref<1x4x8x8xbf16, #tpu.memory_space<vmem>>, vector<1x1x8x8xbf16>,
    %75 = vector.extract_strided_slice %8 {offsets = [0, 24], sizes = [8, 8], strides = [1, 1]} : vector<8x32xbf16> to vector<8x8xbf16>
    %76 = vector.extract_strided_slice %11 {offsets = [0, 24], sizes = [8, 8], strides = [1, 1]} : vector<8x32xbf16> to vector<8x8xbf16>
    %77 = vector.extract_strided_slice %14 {offsets = [0, 24], sizes = [8, 8], strides = [1, 1]} : vector<8x32xbf16> to vector<8x8xbf16>
    %cst_38 = arith.constant dense<0.000000e+00> : vector<8x8xf32>
    %78 = tpu.matmul %75, %76, %cst_38 {dimension_numbers = #tpu.dot_dimension_numbers<[1], [1], [0], [0], [0, 0, 1, 0], [], []>} : vector<8x8xbf16>, vector<8x8xbf16>, vector<8x8xf32> -> vector<8x8xf32>
    %cst_39 = arith.constant dense<0xFF800000> : vector<8xf32>
    %79 = vector.multi_reduction <maximumf>, %78, %cst_39 [1] : vector<8x8xf32> to vector<8xf32>
    %80 = vector.shape_cast %79 : vector<8xf32> to vector<8x1xf32>
    %81 = vector.broadcast %80 : vector<8x1xf32> to vector<8x8xf32>
    %82 = arith.subf %78, %81 : vector<8x8xf32>
    %83 = math.exp %82 : vector<8x8xf32>
    %cst_40 = arith.constant dense<0.000000e+00> : vector<8xf32>
    %84 = vector.multi_reduction <add>, %83, %cst_40 [1] : vector<8x8xf32> to vector<8xf32>
    %85 = vector.shape_cast %84 : vector<8xf32> to vector<8x1xf32>
    %86 = tpu.reciprocal %85 {approx = true} : vector<8x1xf32> -> vector<8x1xf32>
    %87 = vector.broadcast %86 : vector<8x1xf32> to vector<8x8xf32>
    %88 = arith.mulf %83, %87 : vector<8x8xf32>
    %89 = arith.truncf %88 : vector<8x8xf32> to vector<8x8xbf16>
    %cst_41 = arith.constant dense<0.000000e+00> : vector<8x8xf32>
    %90 = tpu.matmul %89, %77, %cst_41 {dimension_numbers = #tpu.dot_dimension_numbers<[1], [0], [0], [1], [0, 0, 1, 1], [], []>} : vector<8x8xbf16>, vector<8x8xbf16>, vector<8x8xf32> -> vector<8x8xf32>
    %91 = arith.truncf %90 : vector<8x8xf32> to vector<8x8xbf16>
    %c0_42 = arith.constant 0 : index
    %c3 = arith.constant 3 : index
    %c0_43 = arith.constant 0 : index
    %c0_44 = arith.constant 0 : index
    %92 = vector.load %arg8[%c0_42, %c3, %c0_43, %c0_44] : memref<1x4x8x8xbf16, #tpu.memory_space<vmem>>, vector<1x1x8x8xbf16>
    %93 = vector.shape_cast %92 : vector<1x1x8x8xbf16> to vector<8x8xbf16>
    %94 = vector.shape_cast %91 : vector<8x8xbf16> to vector<1x1x8x8xbf16>
    tpu.vector_store %arg8[%c0_42, %c3, %c0_43, %c0_44], %94 {strides = array<i32>} : memref<1x4x8x8xbf16, #tpu.memory_space<vmem>>, vector<1x1x8x8xbf16>,
    return
  }
  func.func @transform_0(%arg0: i32, %arg1: i32) -> (i32, i32, i32) {
    %c0_i32 = arith.constant 0 : i32
    %c0_i32_0 = arith.constant 0 : i32
    return %arg0, %arg1, %c0_i32 : i32, i32, i32
  }
  func.func @transform_1(%arg0: i32, %arg1: i32) -> (i32, i32, i32) {
    %c0_i32 = arith.constant 0 : i32
    %c0_i32_0 = arith.constant 0 : i32
    %c0_i32_1 = arith.constant 0 : i32
    return %arg0, %c0_i32, %c0_i32_0 : i32, i32, i32
  }
  func.func @transform_2(%arg0: i32, %arg1: i32) -> (i32, i32, i32) {
    %c0_i32 = arith.constant 0 : i32
    %c0_i32_0 = arith.constant 0 : i32
    %c0_i32_1 = arith.constant 0 : i32
    return %arg0, %c0_i32, %c0_i32_0 : i32, i32, i32
  }
  func.func @transform_3(%arg0: i32, %arg1: i32) -> (i32, i32) {
    %c0_i32 = arith.constant 0 : i32
    %c0_i32_0 = arith.constant 0 : i32
    %c0_i32_1 = arith.constant 0 : i32
    return %c0_i32, %c0_i32_0 : i32, i32
  }
  func.func @transform_4(%arg0: i32, %arg1: i32) -> (i32, i32) {
    %c0_i32 = arith.constant 0 : i32
    %c0_i32_0 = arith.constant 0 : i32
    %c0_i32_1 = arith.constant 0 : i32
    return %c0_i32, %c0_i32_0 : i32, i32
  }
  func.func @transform_5(%arg0: i32, %arg1: i32) -> (i32, i32) {
    %c0_i32 = arith.constant 0 : i32
    %c0_i32_0 = arith.constant 0 : i32
    %c0_i32_1 = arith.constant 0 : i32
    return %c0_i32, %c0_i32_0 : i32, i32
  }
  func.func @transform_6(%arg0: i32, %arg1: i32) -> (i32, i32, i32, i32) {
    %c0_i32 = arith.constant 0 : i32
    %c0_i32_0 = arith.constant 0 : i32
    %c0_i32_1 = arith.constant 0 : i32
    return %arg0, %c0_i32, %arg1, %c0_i32_0 : i32, i32, i32, i32
  }
}

</mosaic_0001>

<bundles_post_ra>
// kernel: tpu_custom_call.1
= control target key start
LH: loop header
LB: loop body
LE: loop exit
PB: predicated region body
PF: predicated region fallthrough
CT: control target
= control target key end

     0   :  { %s1714_s0 = inlined_call_operand.hbm [shape: bf16[2,8,32], index: 0, kind: input, shape index: {}]   ;;  %s1715_s1 = inlined_call_operand.hbm [shape: bf16[2,8,32], index: 1, kind: input, shape index: {}]   ;;  %s1716_s2 = inlined_call_operand.hbm [shape: bf16[2,8,32], index: 2, kind: input, shape index: {}]   ;;  %s1717_s3 = inlined_call_operand.hbm [shape: bf16[32,32], index: 3, kind: input, shape index: {}]   ;;  %s1718_s4 = inlined_call_operand.hbm [shape: bf16[32,32], index: 4, kind: input, shape index: {}]   ;;  %s1719_s5 = inlined_call_operand.hbm [shape: bf16[32,32], index: 5, kind: input, shape index: {}]   ;;  %s1720_s6 = inlined_call_operand.hbm [shape: bf16[2,4,8,8], index: 6, kind: output, shape index: {}]  }
   0x1   :  { %1732 = sst [smem:[#allocation25_spill]] %s1715_s1 }
   0x2   :  { %1733 = sst [smem:[#allocation26_spill]] %s1717_s3 }
   0x3   :  { %1734 = sst [smem:[#allocation27_spill]] %s1718_s4 }
   0x4   :  { %1735 = sst [smem:[#allocation28_spill]] %s1719_s5 }
   0x5   :  { %11 = vsyncpa [#allocation3], 0 }
   0x6   :  { %13 = vsyncpa [#allocation3 + $0x1], 0 }
   0x7   :  { %14 = vsyncpa [#allocation6], 0 }
   0x8   :  { %16 = vsyncpa [#allocation6 + $0x1], 0 }
   0x9   :  { %17 = vsyncpa [#allocation9], 0 }
   0xa   :  { %18 = vsyncpa [#allocation12], 0 }
   0xb   :  { %19 = vsyncpa [#allocation4], 0 }
   0xc   :  { %21 = vsyncpa [#allocation4 + $0x1], 0  ;;  %s1447_s21 = smov 0   ;;  %s1449_s22 = smov 0  }
   0xd   :  { %s1451_s23 = smov 0   ;;  %s1453_s24 = smov 0  }
   0xe   :  { %s1455_s25 = smov 0   ;;  %s1457_s26 = smov 0  }
   0xf LB: > { %1736 = sst [smem:[#allocation19_spill]] %s1380_s21  ;;  %s1478_s27 = sadd.s32 4294967295, %s1400_s26   ;;  %s1400_s26 = sphi %s1457_s26, %s27_s26   ;;  %s1396_s25 = sphi %s1455_s25, %s1761_s25   ;;  %s1392_s24 = sphi %s1453_s24, %s1760_s24   ;;  %s1388_s23 = sphi %s1451_s23, %s1764_s23   ;;  %s1384_s22 = sphi %s1449_s22, %s1763_s22   ;;  %s1380_s21 = sphi %s1447_s21, %s1762_s21  }
  0x10   : > { %1737 = sst [smem:[#allocation20_spill]] %s1396_s25  ;;  %p931_p0 = scmp.ge.s32.totalorder %s1400_s26, 1 }
  0x11   : > { %1738 = sst [smem:[#allocation21_spill]] %s1400_s26  ;;  %p62_p1 = scmp.eq.s32.totalorder %s1478_s27, 0 }
  0x12   : > { %p215_p2 = scmp.lt.s32.totalorder %s1400_s26, 3  ;;  %s1739_s3 = sld [smem:[#allocation26_spill]] }
  0x13   : > { %s1402_s8 = smov [#allocation8]   ;;  %p935_p6 = scmp.ge.s32.totalorder %s1400_s26, 2 }
  0x14   : > { %p1486_p3 = pnand %p931_p0, %p215_p2  ;;  %s228_s9 = sshll.u32 %s1402_s8, 4  ;;  %s229_s9 = int_to_ptr.vmem [resolvable:$true] %s228_s9 }
  0x15   : > { %s1721_s11 = smov 64   ;;  %s1723_s12 = smov 4  }
  0x16   : > { %p1020_p4 = pneg %p1486_p3  ;;  %s930_s13 = sadd.s32 4294967294, %s1400_s26  }
  0x17   : > { %s39_s14 = sadd.s32 1, %s1396_s25  ;;  %s48_s15 = sadd.s32 1, %s1388_s23 }
  0x18   : > { %s226_s30 = sshll.u32 %s1739_s3, 4  ;;  %p1494_p5 = pnand %p1020_p4, %p62_p1  ;;  %s227_s30 = int_to_ptr.hbm [resolvable:$true] %s226_s30 }
  0x19   : > { %p41_p7 = scmp.ge.s32.totalorder %s39_s14, 2  ;;  %p55_p8 = scmp.ne.s32.totalorder %s1388_s23, %s1384_s22 }
  0x1a   : > { %1023 = dma.hbm_to_vmem [thread:$0]  (!%p1494_p5), %s227_s30, 256, %s229_s9, [#allocation9], %s1721_s11, %s1721_s11, %s1723_s12  }
  0x1b   : > { %p56_p9 = scmp.eq.s32.totalorder %s1400_s26, 0  ;;  %p61_p10 = scmp.ne.s32.totalorder %s1384_s22, %s1380_s21 }
  0x1c   : > { %s1766_s14 = smov (%p41_p7, %s39_s14), 0  ;;  %p202_p13 = scmp.eq.s32.totalorder %s1478_s27, 1 }
  0x1d   : > { %1742 = sst [smem:[#allocation22_spill]] %s1766_s14  ;;  %p1514_p11 = por %p56_p9, %p55_p8 }
  0x1e   : > { %p1520_p12 = por %p62_p1, %p61_p10  ;;  %s43_s18 = ssub.s32 %s1396_s25, %s1766_s14 }
  0x1f   : > { %p46_p0 = scmp.eq.s32.totalorder %s43_s18, 0  ;;  %p208_p2 = scmp.eq.s32.totalorder %s930_s13, 1 }
  0x20   : > { %p1527_p4 = por %p202_p13, %p55_p8  ;;  %p1047_p7 = scmp.lt.s32.totalorder %s1400_s26, 2 }
  0x21   : > { %s1533_s20 = scalar_select %p46_p0, %s1388_s23, %s48_s15  }
  0x22   : > { %p1535_p9 = por %p208_p2, %p61_p10  ;;  %s1725_s29 = sand.u32 1, %s1388_s23  }
  0x23   : > { %1746 = sst [smem:[#allocation23_spill]] %s1533_s20  ;;  %s1542_s30 = sshll.u32 %s1725_s29, 2 }
  0x24   : > { %s1747_s28 = scalar_select %p1535_p9, 1, 0 }
  0x25   : > { %s1545_s8 = sshll.u32 %s1396_s25, 2  ;;  %p1549_p8 = pnand %p1047_p7, %p1514_p11 }
  0x26   : > { %1748 = sst [smem:[#allocation24_spill]] %s1747_s28  ;;  %s290_s13 = sand.u32 1, %s1400_s26  }
  0x27   : > { %s1750_s1 = sld [smem:[#allocation25_spill]]  ;;  %s294_s3 = scalar_lea.vmem [#allocation5], %s1542_s30 }
  0x28   : > { %s302_s29 = sshll.u32 %s294_s3, 4  ;;  %s1559_s16 = scalar_lea.sflag [#allocation6], %s290_s13  ;;  %s303_s29 = int_to_ptr.vmem [resolvable:$true] %s302_s29 }
  0x29   : > { %s1751_s4 = sld [smem:[#allocation27_spill]]  ;;  %s1405_s15 = smov [#allocation10]  }
  0x2a   : > { %s1752_s5 = sld [smem:[#allocation28_spill]]  ;;  %s1753_s13 = smov 4  }
  0x2b   : > { %s1754_s26 = smov 64   ;;  %s1406_s25 = smov [#allocation11]  }
  0x2c   : > { %s274_s3 = scalar_lea.vmem [#allocation2], %s1542_s30  ;;  %s313_s28 = scalar_lea.vmem [#allocation7], %s1542_s30 }
  0x2d   : > { %s298_s11 = scalar_lea.hbm %s1750_s1, %s1545_s8  ;;  %s283_s18 = sshll.u32 %s274_s3, 4  ;;  %s284_s18 = int_to_ptr.vmem [resolvable:$true] %s283_s18 }
  0x2e   : > { %s300_s12 = sshll.u32 %s298_s11, 4  ;;  %s242_s11 = sshll.u32 %s1405_s15, 4  ;;  %s301_s12 = int_to_ptr.hbm [resolvable:$true] %s300_s12  ;;  %s243_s11 = int_to_ptr.vmem [resolvable:$true] %s242_s11 }
  0x2f   : > { %1036 = dma.hbm_to_vmem [thread:$0]  (!%p1549_p8), %s301_s12, 64, %s303_s29, %s1559_s16  }
  0x30   : > { %s240_s20 = sshll.u32 %s1751_s4, 4  ;;  %s254_s1 = sshll.u32 %s1752_s5, 4  ;;  %s241_s20 = int_to_ptr.hbm [resolvable:$true] %s240_s20  ;;  %s255_s1 = int_to_ptr.hbm [resolvable:$true] %s254_s1 }
  0x31   : > { %1026 = dma.hbm_to_vmem [thread:$0]  (!%p1494_p5), %s241_s20, 256, %s243_s11, [#allocation9], %s1754_s26, %s1754_s26, %s1753_s13  }
  0x32   : > { %s256_s12 = sshll.u32 %s1406_s25, 4  ;;  %s279_s15 = scalar_lea.hbm %s1714_s0, %s1545_s8  ;;  %s257_s12 = int_to_ptr.vmem [resolvable:$true] %s256_s12 }
  0x33   : > { %1029 = dma.hbm_to_vmem [thread:$0]  (!%p1494_p5), %s255_s1, 256, %s257_s12, [#allocation12], %s1754_s26, %s1754_s26, %s1753_s13  }
  0x34   : > { %s281_s4 = sshll.u32 %s279_s15, 4  ;;  %s1755_s20 = sand.u32 1, %s1388_s23   ;;  %s282_s4 = int_to_ptr.hbm [resolvable:$true] %s281_s4 }
  0x35   : > { %s271_s11 = scalar_lea.sflag [#allocation3], %s1755_s20  ;;  %s317_s5 = scalar_lea.hbm %s1716_s2, %s1545_s8 }
  0x36   : > { %1033 = dma.hbm_to_vmem [thread:$0]  (!%p1549_p8), %s282_s4, 64, %s284_s18, %s271_s11  }
  0x37   : > { %s321_s21 = sshll.u32 %s313_s28, 4  ;;  %s319_s1 = sshll.u32 %s317_s5, 4  ;;  %s322_s21 = int_to_ptr.vmem [resolvable:$true] %s321_s21  ;;  %s320_s1 = int_to_ptr.hbm [resolvable:$true] %s319_s1 }
  0x38   : > { %1039 = dma.hbm_to_vmem [thread:$0]  (!%p1549_p8), %s320_s1, 64, %s322_s21, %s1559_s16  }
  0x39   : > { %330 = sbr.rel (%p1486_p3) target bundleno = 890 (0x37a), region = 44  ;;  %s1600_s26 = sand.u32 (!%p1486_p3), 1, %s1384_s22  }
  0x3a   : > { %s1603_s4 = sshll.u32 (!%p1486_p3), %s1600_s26, 2  ;;  %s333_s8 = scalar_lea.sflag (!%p1486_p3), [#allocation3], %s1600_s26 }
  0x3b   : > { %s336_s30 = scalar_lea.vmem (!%p1486_p3), [#allocation2], %s1603_s4 }
  0x3e   : > { %1359 = dma.done.wait (%p1520_p12), %s333_s8, 64  }
  0x3f   : > { %1361 = vsyncadd (%p1520_p12), %s333_s8, 4294967232  ;;  %s342_s5 = sand.u32 1, %s1478_s27   ;;  %s346_s7 = scalar_lea.vmem [#allocation5], %s1603_s4 }
  0x40   : > { %s343_s21 = scalar_lea.sflag [#allocation6], %s342_s5 }
  0x41   : > { %1363 = dma.done.wait (%p1520_p12), %s343_s21, 128  }
  0x42   : > { %1365 = vsyncadd (%p1520_p12), %s343_s21, 4294967168  ;;  %s356_s28 = scalar_lea.vmem [#allocation7], %s1603_s4 }
  0x43   : > { %1367 = dma.done.wait (%p62_p1), [#allocation9], 512  }
  0x44   : > { %1369 = vsyncadd (%p62_p1), [#allocation9], 4294966784 }
  0x45   : > { %1371 = dma.done.wait (%p62_p1), [#allocation12], 256  }
  0x46   : > { %1373 = vsyncadd (%p62_p1), [#allocation12], 4294967040  ;;  %v994_v0 = vld [vmem:[#allocation8 + $0x8] sm:$0xff]  ;;  %v996_v1 = vld [vmem:[#allocation10 + $0x8] sm:$0xff]  ;;  %vm431_vm0 = vcmask 261120   ;;  %vm515_vm1 = vcmask 64512  }
  0x47   : > { %441 = vmatpush.bf16.msra.mxu0 %v994_v0  ;;  %474 = vmatpush.bf16.msra.mxu1 %v996_v1  ;;  %v993_v2 = vld [vmem:[#allocation8] sm:$0xff]  ;;  %v995_v3 = vld [vmem:[#allocation10] sm:$0xff]  ;;  %v412_v4 = vld [vmem:[%s336_s30] sm:$0xf]  ;;  %s1407_s27 = smov 112   ;;  %s1408_s17 = smov 120  }
  0x48   : > { %v413_v5 = vld [vmem:[%s346_s7] sm:$0xf]  ;;  %s1409_s9 = smov 104   ;;  %v998_v17 = vld [vmem:[#allocation11 + $0x8] sm:$0xff]  ;;  %v997_v30 = vld [vmem:[#allocation11] sm:$0xff]  ;;  %vm550_vm2 = vcmask 1043456  }
  0x49   : > { %507 = vmatpush.bf16.msra.mxu2 %v998_v17  ;;  %v414_v31 = vld [vmem:[%s356_s28] sm:$0xf]  ;;  %s949_s16 = sshll.u32 %s1600_s26, 4  ;;  %vm568_vm3 = vcmask 60416   ;;  %s999_s12 = sshll.u32 %s1392_s24, 4 }
  0x4a   : > { %s1661_s13 = scalar_lea.vmem [#allocation13], %s949_s16  ;;  %s769_s15 = scalar_lea.hbm %s1720_s6, %s999_s12 }
  0x4b   : > { %442 = vmatpush.bf16.msra.mxu0 %v993_v2  ;;  %475 = vmatpush.bf16.msra.mxu1 %v995_v3  ;;  %s770_s3 = sshll.u32 %s1661_s13, 4  ;;  %s772_s18 = sshll.u32 %s769_s15, 4  ;;  %s771_s3 = int_to_ptr.vmem [resolvable:$true] %s770_s3  ;;  %s773_s18 = int_to_ptr.hbm [resolvable:$true] %s772_s18 }
  0x4c   : > { %s757_s20 = scalar_lea.sflag [#allocation4], %s1600_s26  ;;  %s1320_s24 = sshra.s32 %s773_s18, 4  ;;  %s1321_s24 = int_to_ptr.hbm [resolvable:$true] %s1320_s24 }
  0x4d   : > { %508 = vmatpush.bf16.msra.mxu2 %v997_v30  ;;  %s1322_s11 = scalar_lea.hbm %s1321_s24, 16  ;;  %s1326_s1 = scalar_lea.hbm %s1720_s6, 32 }
  0x4e   : > { %958 = vmatmul.msk.bf16.vlgmr.msra.gmra.mxu0 %vm431_vm0, %v412_v4  ;;  %967 = vmatmul.msk.bf16.vlgmr.msra.gmra.mxu1 %vm431_vm0, %v413_v5  ;;  %p1323_p1 = scmp.ne.s32.totalorder %s1321_s24, %s1322_s11  ;;  %p1327_p10 = scmp.lt.s32.totalorder %s1321_s24, %s1720_s6 }
  0x4f   : > { %p1328_p11 = scmp.lt.s32.totalorder %s1326_s1, %s1322_s11 }
  0x50   : > { %976 = vmatmul.msk.bf16.vlgmr.msra.gmra.mxu2 %vm431_vm0, %v414_v31  ;;  %p1324_p3 = pnand %p1323_p1, %p1527_p4 }
  0x51   : > { %p1329_p12 = por %p1328_p11, %p1327_p10 }
  0x52   : > { %p1325_p5 = pneg %p1324_p3 }
  0x54   : > { %p1330_p13 = pnand %p1329_p12, %p1325_p5 }
  0xcb   : > { %v444_v6 = vpop.f32.mrf.mxu0  ;;  %v477_v7 = vpop.f32.mrf.mxu1 }
  0xcc   : > { %v448_v8 = vpack.c.bf16 %v444_v6, %v444_v6  ;;  %v481_v9 = vpack.c.bf16 %v477_v7, %v477_v7 }
  0xce   : > { %v571_v10 = vunpack.c.l.b16 %v448_v8  ;;  %v576_v11 = vunpack.c.l.b16 %v481_v9  ;;  %v520_v12 = vsel %vm515_vm1, %v481_v9, 0 }
  0xcf   : > { %529 = vmatpush.bf16.xpose.msra.mxu3 %v520_v12 }
  0xd0   : > { %v572_v13 = vpack.c.b16 %v571_v10, %v571_v10  ;;  %v577_v14 = vpack.c.b16 %v576_v11, %v576_v11 }
  0xd2   : > { %640 = vrot.lane.b32.xlu1 %v577_v14, %s1407_s27  ;;  %578 = vrot.lane.b32.xlu0 %v577_v14, %s1408_s17 }
  0xd3   : > { %638 = vrot.lane.b32.xlu2 %v572_v13, %s1407_s27  ;;  %v446_v15 = vpop.f32.mrf.mxu0  ;;  %v479_v16 = vpop.f32.mrf.mxu1 }
  0xd4   : > { %v510_v46 = vpop.f32.mrf.mxu2 }
  0xd5   : > { %v514_v47 = vpack.c.bf16 %v510_v46, %v510_v46 }
  0xd6   : > { %977 = vmatmul.msk.bf16.vlgmr.msra.gmra.mxu3 %vm515_vm1, %v448_v8 }
  0xd7   : > { %v612_v48 = vunpack.c.l.b16 %v514_v47  ;;  %v552_v49 = vsel %vm550_vm2, %v514_v47, 0 }
  0xd8   : > { %561 = vmatpush.bf16.msrb.mxu0 %v552_v49 }
  0xd9   : > { %v613_v50 = vpack.c.b16 %v612_v48, %v612_v48 }
  0xda   : > { %699 = vrot.lane.b32.xlu1 %v577_v14, %s1409_s9  ;;  %573 = vrot.lane.b32.xlu0 %v572_v13, %s1408_s17 }
  0xdb   : > { %697 = vrot.lane.b32.xlu2 %v572_v13, %s1409_s9 }
  0xdc   : > { %v512_v51 = vpop.f32.mrf.mxu2 }
 0x12d   : > { %v639_v22 = vpop.permute.xlu2 %638 }
 0x135   : > { %v698_v28 = vpop.permute.xlu2 %697 }
 0x144   : > { %v641_v18 = vpop.permute.xlu1 %640  ;;  %v579_v19 = vpop.permute.xlu0 %578 }
 0x145   : > { %v584_v20 = vsel %vm515_vm1, %v579_v19, 0  ;;  %v646_v21 = vsel %vm515_vm1, %v641_v18, 0 }
 0x146   : > { %593 = vmatpush.bf16.xpose.msrb.mxu1 %v584_v20  ;;  %655 = vmatpush.bf16.xpose.msrb.mxu3 %v646_v21 }
 0x14c   : > { %v700_v23 = vpop.permute.xlu1 %699  ;;  %v574_v24 = vpop.permute.xlu0 %573 }
 0x14d   : > { %v705_v25 = vsel %vm515_vm1, %v700_v23, 0  ;;  %979 = vmatmul.msk.bf16.vlgmr.msrb.gmra.mxu1 %vm515_vm1, %v574_v24  ;;  %982 = vmatmul.msk.bf16.vlgmr.msrb.gmra.mxu3 %vm515_vm1, %v639_v22 }
 0x14e   : > { %714 = vmatpush.bf16.xpose.msra.mxu1 %v705_v25 }
 0x159   : > { %v531_v26 = vpop.f32.mrf.mxu3 }
 0x15a   : > { %v535_v27 = vsel %vm515_vm1, %v531_v26, -inf }
 0x15b   : > { %536 = vmax.xlane.f32.xlu1 %v535_v27 }
 0x15d   : > { %985 = vmatmul.msk.bf16.vlgmr.msra.gmra.mxu1 %vm515_vm1, %v698_v28 }
 0x161   : > { %v533_v29 = vpop.f32.mrf.mxu3 }
 0x1ca   : > { %v595_v32 = vpop.f32.mrf.mxu1 }
 0x1cb   : > { %v599_v33 = vsel %vm515_vm1, %v595_v32, -inf }
 0x1cc   : > { %600 = vmax.xlane.f32.xlu0 %v599_v33 }
 0x1ce   : > { %v537_v34 = vpop.xlane.xlu1 %536 }
 0x1cf   : > { %v538_v35 = vsub.f32 %v531_v26, %v537_v34 }
 0x1d0   : > { %v657_v36 = vpop.f32.mrf.mxu3 }
 0x1d1   : > { %v539_v37 = vmul.f32 1.442695, %v538_v35  ;;  %v661_v45 = vsel %vm515_vm1, %v657_v36, -inf }
 0x1d2   : > { %v597_v38 = vpop.f32.mrf.mxu1 }
 0x1d3   : > { %1110 = vpow2.f32 %v539_v37 }
 0x1d8   : > { %v659_v39 = vpop.f32.mrf.mxu3 }
 0x1d9   : > { %v1111_v40 = vpop.eup %1110 }
 0x1da   : > { %v716_v41 = vpop.f32.mrf.mxu1  ;;  %v541_v42 = vsel %vm515_vm1, %v1111_v40, 0.0 }
 0x1db   : > { %542 = vadd.xlane.f32.xlu1 %v541_v42  ;;  %v720_v43 = vsel %vm515_vm1, %v716_v41, -inf }
 0x1dc   : > { %721 = vmax.xlane.f32.xlu2 %v720_v43 }
 0x1e2   : > { %v718_v44 = vpop.f32.mrf.mxu1 }
 0x1e4   : > { %662 = vmax.xlane.f32.xlu2 %v661_v45 }
 0x1fc   : > { %614 = vrot.lane.b32.xlu2 %v613_v50, %s1408_s17 }
 0x23f   : > { %v601_v52 = vpop.xlane.xlu0 %600 }
 0x240   : > { %v602_v53 = vsub.f32 %v595_v32, %v601_v52 }
 0x242   : > { %v603_v54 = vmul.f32 1.442695, %v602_v53 }
 0x244   : > { %1112 = vpow2.f32 %v603_v54 }
 0x24a   : > { %v1113_v55 = vpop.eup %1112 }
 0x24b   : > { %v605_v56 = vsel %vm515_vm1, %v1113_v55, 0.0 }
 0x24c   : > { %606 = vadd.xlane.f32.xlu0 %v605_v56 }
 0x24e   : > { %v543_v57 = vpop.xlane.xlu1 %542 }
 0x24f   : > { %1114 = vrcp.f32 %v543_v57  ;;  %v722_v58 = vpop.xlane.xlu2 %721 }
 0x250   : > { %v723_v59 = vsub.f32 %v716_v41, %v722_v58 }
 0x252   : > { %v724_v60 = vmul.f32 1.442695, %v723_v59 }
 0x254   : > { %1116 = vpow2.f32 %v724_v60 }
 0x255   : > { %v1115_v61 = vpop.eup %1114 }
 0x256   : > { %v545_v62 = vmul.f32 %v1115_v61, %v1111_v40 }
 0x257   : > { %v663_v63 = vpop.xlane.xlu2 %662 }
 0x258   : > { %v664_v0 = vsub.f32 %v657_v36, %v663_v63  ;;  %v546_v1 = vpack.c.bf16 %v545_v62, %v545_v62 }
 0x25a   : > { %v1117_v2 = vpop.eup %1116  ;;  %v665_v3 = vmul.f32 1.442695, %v664_v0  ;;  %978 = vmatmul.msk.bf16.vlgmr.msrb.gmra.mxu0 %vm515_vm1, %v546_v1 }
 0x25b   : > { %v726_v4 = vsel %vm515_vm1, %v1117_v2, 0.0 }
 0x25c   : > { %1118 = vpow2.f32 %v665_v3  ;;  %727 = vadd.xlane.f32.xlu0 %v726_v4 }
 0x25f   : > { %v615_v7 = vpop.permute.xlu2 %614 }
 0x260   : > { %v620_v8 = vsel %vm550_vm2, %v615_v7, 0 }
 0x261   : > { %629 = vmatpush.bf16.msrb.mxu2 %v620_v8 }
 0x262   : > { %v1119_v5 = vpop.eup %1118 }
 0x263   : > { %v667_v6 = vsel %vm515_vm1, %v1119_v5, 0.0 }
 0x264   : > { %668 = vadd.xlane.f32.xlu1 %v667_v6 }
 0x270   : > { %732 = vrot.lane.b32.xlu0 %v613_v50, %s1409_s9 }
 0x27d   : > { %673 = vrot.lane.b32.xlu1 %v613_v50, %s1407_s27 }
 0x2bf   : > { %v607_v9 = vpop.xlane.xlu0 %606 }
 0x2c0   : > { %1120 = vrcp.f32 %v607_v9 }
 0x2c6   : > { %v1121_v10 = vpop.eup %1120 }
 0x2c7   : > { %v609_v11 = vmul.f32 %v1121_v10, %v1113_v55 }
 0x2c9   : > { %v610_v12 = vpack.c.bf16 %v609_v11, %v609_v11 }
 0x2cb   : > { %980 = vmatmul.msk.bf16.vlgmr.msrb.gmra.mxu2 %vm515_vm1, %v610_v12 }
 0x2cf   : > { %v728_v13 = vpop.xlane.xlu0 %727 }
 0x2d0   : > { %1122 = vrcp.f32 %v728_v13 }
 0x2d6   : > { %v1123_v16 = vpop.eup %1122 }
 0x2d7   : > { %v563_v14 = vpop.f32.mrf.mxu0  ;;  %v730_v18 = vmul.f32 %v1123_v16, %v1117_v2  ;;  %v669_v19 = vpop.xlane.xlu1 %668 }
 0x2d8   : > { %v567_v15 = vpack.c.bf16 %v563_v14, %v563_v14  ;;  %1124 = vrcp.f32 %v669_v19 }
 0x2d9   : > { %v731_v22 = vpack.c.bf16 %v730_v18, %v730_v18 }
 0x2da   : > { %569 = vst.msk [vmem:[%s1661_s13] sm:$0xf] %vm568_vm3, %v567_v15 }
 0x2de   : > { %v1125_v23 = vpop.eup %1124 }
 0x2df   : > { %v565_v17 = vpop.f32.mrf.mxu0  ;;  %v671_v24 = vmul.f32 %v1125_v23, %v1119_v5 }
 0x2e1   : > { %v672_v27 = vpack.c.bf16 %v671_v24, %v671_v24 }
 0x2e2   : > { %v733_v20 = vpop.permute.xlu0 %732 }
 0x2e3   : > { %v738_v21 = vsel %vm550_vm2, %v733_v20, 0 }
 0x2e4   : > { %747 = vmatpush.bf16.msra.mxu2 %v738_v21 }
 0x2e7   : > { %986 = vmatmul.msk.bf16.vlgmr.msra.gmra.mxu2 %vm515_vm1, %v731_v22 }
 0x2ef   : > { %v674_v25 = vpop.permute.xlu1 %673 }
 0x2f0   : > { %v679_v26 = vsel %vm550_vm2, %v674_v25, 0 }
 0x2f1   : > { %688 = vmatpush.bf16.msra.mxu0 %v679_v26 }
 0x2f4   : > { %983 = vmatmul.msk.bf16.vlgmr.msra.gmra.mxu0 %vm515_vm1, %v672_v27 }
 0x34e   : > { %v631_v28 = vpop.f32.mrf.mxu2 }
 0x34f   : > { %v635_v29 = vpack.c.bf16 %v631_v28, %v631_v28 }
 0x351   : > { %981 = vst.msk [vmem:[%s1661_s13 + $0x4] sm:$0xf] %vm568_vm3, %v635_v29 }
 0x356   : > { %v633_v30 = vpop.f32.mrf.mxu2 }
 0x36a   : > { %v749_v31 = vpop.f32.mrf.mxu2 }
 0x36b   : > { %v753_v32 = vpack.c.bf16 %v749_v31, %v749_v31 }
 0x36d   : > { %987 = vst.msk [vmem:[%s1661_s13 + $0xc] sm:$0xf] %vm568_vm3, %v753_v32 }
 0x371   : > { %v690_v33 = vpop.f32.mrf.mxu0 }
 0x372   : > { %v694_v34 = vpack.c.bf16 %v690_v33, %v690_v33  ;;  %v751_v35 = vpop.f32.mrf.mxu2 }
 0x374   : > { %984 = vst.msk [vmem:[%s1661_s13 + $0x8] sm:$0xf] %vm568_vm3, %v694_v34 }
 0x375   : > { %1333 = shalt.err (!%p1330_p13)
}
 0x376   : > { %s1410_s26 = smov 64   ;;  %s1411_s30 = smov 4  }
 0x377   : > { %1018 = dma.vmem_to_hbm [thread:$0]  (%p1527_p4), %s771_s3, 256, %s773_s18, %s757_s20, %s1410_s26, %s1410_s26, %s1411_s30  }
 0x379   : > { %v692_v36 = vpop.f32.mrf.mxu0 }
 0x37a PF: > { %s1756_s5 = sld [smem:[#allocation19_spill]]  ;;  %p1041_p0 = pnand %p935_p6, %p1535_p9 }
 0x37b   : > { %s1758_s7 = sld [smem:[#allocation21_spill]] }
 0x37c   : > { %p1042_p2 = pneg %p1041_p0 }
 0x380   : > { %s787_s28 = sand.u32 1, %s1756_s5  }
 0x381   : > { %s788_s27 = scalar_lea.sflag [#allocation4], %s787_s28 }
 0x382   : > { %1375 = dma.done.wait (%p1042_p2), %s788_s27, 256  }
 0x383   : > { %1377 = vsyncadd (%p1042_p2), %s788_s27, 4294967040  ;;  %s27_s26 = sadd.s32 1, %s1758_s7   ;;  %s1759_s19 = sld [smem:[#allocation23_spill]] }
 0x384   : > { %p24_p7 = scmp.ge.s32.totalorder %s27_s26, 4   ;;  %s1760_s24 = sld [smem:[#allocation20_spill]] }
 0x385   : > { %s1761_s25 = sld [smem:[#allocation22_spill]]  ;;  %s1762_s21 = smov %s1384_s22 }
 0x386   : > { %s1763_s22 = smov %s1388_s23  ;;  %26 = sbr.rel (!%p24_p7) target bundleno = 15 (0xf), region = 128 }
 0x389   : > { %s1764_s23 = smov %s1759_s19 }
 0x38b   :  { %794 = vsyncpa [#allocation3], 1 }
 0x38c   :  { %796 = vsyncpa [#allocation3 + $0x1], 1 }
 0x38d   :  { %797 = vsyncpa [#allocation6], 1 }
 0x38e   :  { %799 = vsyncpa [#allocation6 + $0x1], 1 }
 0x38f   :  { %800 = vsyncpa [#allocation9], 1 }
 0x390   :  { %801 = vsyncpa [#allocation12], 1 }
 0x391   :  { %802 = vsyncpa [#allocation4], 1 }
 0x392   :  { %804 = vsyncpa [#allocation4 + $0x1], 1 }

</bundles_post_ra>
